<compile_context>
chip_gen: v7x
topology: tpu7x:2x2x1
jax: 0.10.0
libtpu: 0.0.40
codegen_flags: <defaults>
</compile_context>

<pallas_src>
import math
import numpy as np
import jax
import jax.numpy as jnp
from jax import lax
from jax.experimental import pallas as pl
from jax.experimental.pallas import tpu as pltpu

# ----------------------------- model configuration -----------------------------
POSE_DIM = 16           # flattened 4x4 SE(3) matrix
TIME_DIM = 16           # NaivePolicy dim=16 -> sinusoidal time embedding size
HALF_T = TIME_DIM // 2
OUTPUT_SIZE = 6         # 3 rot + 3 trans velocity
OP_PAD = 8              # output rows padded 6 -> 8 (sublane multiple) in the transposed output
HIDDEN = 128            # MLP hidden width
MAX_TB = 1024           # max batch-tile rows per grid step


def _round_up(x, m):
    return ((x + m - 1) // m) * m


def _choose_batch_tiling(batch):
    """Return (tile_rows, padded_batch).

    The transposed lane-dense output block (OP_PAD, TB) requires TB % 128 == 0 whenever grid > 1,
    so small batches (<=128 rows) stay single-tile; larger batches are padded to a multiple of 256
    and split into >= 2 tiles so both v7x TensorCores get work (neutral on 1-TC v5e/v6e)."""
    bp = _round_up(max(batch, 1), 8)
    if bp <= 128:
        return bp, bp                     # single tile, all blocks full-extent
    if bp <= 2 * MAX_TB:
        bp = _round_up(bp, 256)
        return bp // 2, bp                # 2 tiles, each a multiple of 128 rows
    bp = _round_up(bp, MAX_TB)
    return MAX_TB, bp                     # grid >= 3, 1024-row tiles (HBM-roofline regime)


# ----------------------------- Pallas kernel -----------------------------------
def _silu(h):
    # h * sigmoid(h) = h / (1 + exp(-h)); exp and approx reciprocal both use the EUP slot.
    return h * pl.reciprocal(1.0 + jnp.exp(-h), approx=True)


def _mlp_kernel(x_ref, t_ref, c_ref,
                w1x_ref, w1ts_ref, w1tc_ref, w1c_ref, b1_ref,
                w2_ref, b2_ref, w3t_ref, b3t_ref, out_ref):
    # ---- in-kernel sinusoidal time embedding (EUP sin/cos; no HBM-materialized t_emb) ----
    k = lax.broadcasted_iota(jnp.int32, (1, HALF_T), 1).astype(jnp.float32)
    freqs = jnp.exp(k * (-math.log(10000.0) / (HALF_T - 1)))          # (1, HALF_T)
    args = t_ref[...] * freqs                                         # (TB, HALF_T)
    sin_e = jnp.sin(args)
    cos_e = jnp.cos(args)

    # ---- layer 1: segmented dots against row-slices of W1 (fused feature assembly) ----
    h = jnp.dot(x_ref[...].astype(jnp.bfloat16), w1x_ref[...],
                preferred_element_type=jnp.float32)
    h += jnp.dot(sin_e.astype(jnp.bfloat16), w1ts_ref[...],
                 preferred_element_type=jnp.float32)
    h += jnp.dot(cos_e.astype(jnp.bfloat16), w1tc_ref[...],
                 preferred_element_type=jnp.float32)
    h += jnp.dot(c_ref[...].astype(jnp.bfloat16), w1c_ref[...],
                 preferred_element_type=jnp.float32)
    h = _silu(h + b1_ref[...])                                        # f32 elementwise (v5e-safe)

    # ---- layer 2 ----
    h = jnp.dot(h.astype(jnp.bfloat16), w2_ref[...], preferred_element_type=jnp.float32)
    h = _silu(h + b2_ref[...])

    # ---- layer 3: transposed output (OP_PAD, TB) -> batch lane-dense f32 stores ----
    o_t = lax.dot_general(w3t_ref[...], h.astype(jnp.bfloat16),
                          dimension_numbers=(((1,), (1,)), ((), ())),   # W3^T @ h^T
                          preferred_element_type=jnp.float32)           # (OP_PAD, TB)
    out_ref[...] = o_t + b3t_ref[...]


def _mlp_pallas(x_flat, t2d, c_flat, params, tb, bp):
    ctx_dim = c_flat.shape[-1]
    d_in = POSE_DIM + TIME_DIM + ctx_dim
    grid = (bp // tb,)

    flops = 2 * bp * (d_in * HIDDEN + HIDDEN * HIDDEN + HIDDEN * OP_PAD)
    transcendentals = bp * (TIME_DIM + 4 * HIDDEN)
    bytes_accessed = (bp * (POSE_DIM + 1 + ctx_dim) * 4                        # f32 inputs
                      + 2 * (d_in * HIDDEN + HIDDEN * HIDDEN + OP_PAD * HIDDEN)  # bf16 weights
                      + 4 * (2 * HIDDEN + OP_PAD)                              # f32 biases
                      + bp * OP_PAD * 4)                                       # f32 output

    return pl.pallas_call(
        _mlp_kernel,
        out_shape=jax.ShapeDtypeStruct((OP_PAD, bp), jnp.float32),
        grid_spec=pltpu.PrefetchScalarGridSpec(
            num_scalar_prefetch=0,
            grid=grid,
            in_specs=[
                pl.BlockSpec((tb, POSE_DIM), lambda i: (i, 0)),     # x_flat   (batch-tiled)
                pl.BlockSpec((tb, 1), lambda i: (i, 0)),            # t        (batch-tiled)
                pl.BlockSpec((tb, ctx_dim), lambda i: (i, 0)),      # context  (batch-tiled)
                pl.BlockSpec((POSE_DIM, HIDDEN), lambda i: (0, 0)),  # W1 rows 0:16   (resident)
                pl.BlockSpec((HALF_T, HIDDEN), lambda i: (0, 0)),    # W1 rows 16:24  (sin)
                pl.BlockSpec((HALF_T, HIDDEN), lambda i: (0, 0)),    # W1 rows 24:32  (cos)
                pl.BlockSpec((ctx_dim, HIDDEN), lambda i: (0, 0)),   # W1 rows 32:d_in
                pl.BlockSpec((1, HIDDEN), lambda i: (0, 0)),         # b1
                pl.BlockSpec((HIDDEN, HIDDEN), lambda i: (0, 0)),    # W2
                pl.BlockSpec((1, HIDDEN), lambda i: (0, 0)),         # b2
                pl.BlockSpec((OP_PAD, HIDDEN), lambda i: (0, 0)),    # W3^T (rows padded 6->8)
                pl.BlockSpec((OP_PAD, 1), lambda i: (0, 0)),         # b3 (column, padded)
            ],
            out_specs=pl.BlockSpec((OP_PAD, tb), lambda i: (0, i)),
        ),
        compiler_params=pltpu.CompilerParams(dimension_semantics=("parallel",)),
        cost_estimate=pl.CostEstimate(
            flops=flops, transcendentals=transcendentals, bytes_accessed=bytes_accessed),
    )(x_flat, t2d, c_flat,
      params["w1x"], params["w1ts"], params["w1tc"], params["w1c"], params["b1"],
      params["w2"], params["b2"], params["w3t"], params["b3t"])


# ----------------------------- JAX glue ----------------------------------------
def sinusoidal_time_embedding(t, dim):
    """Pure-JAX reference embedding (matches the in-kernel computation)."""
    half = dim // 2
    freqs = jnp.exp(-math.log(10000.0) * jnp.arange(half, dtype=jnp.float32) / (half - 1))
    args = t[:, None].astype(jnp.float32) * freqs[None, :]
    return jnp.concatenate([jnp.sin(args), jnp.cos(args)], axis=-1)


def init_params(key, n_context):
    """Deterministic synthetic init (shapes implied by NaivePolicy(dim=16, output_size=6))."""
    d_in = POSE_DIM + TIME_DIM + n_context * POSE_DIM
    ctx_dim = n_context * POSE_DIM
    k1, k2, k3, kb1, kb2, kb3 = jax.random.split(key, 6)

    def linear(k, fan_in, fan_out):
        bound = 1.0 / math.sqrt(fan_in)
        return jax.random.uniform(k, (fan_in, fan_out), jnp.float32, -bound, bound)

    w1 = linear(k1, d_in, HIDDEN)
    w2 = linear(k2, HIDDEN, HIDDEN)
    w3 = linear(k3, HIDDEN, OUTPUT_SIZE)
    b1 = jax.random.uniform(kb1, (1, HIDDEN), jnp.float32, -0.05, 0.05)
    b2 = jax.random.uniform(kb2, (1, HIDDEN), jnp.float32, -0.05, 0.05)
    b3 = jax.random.uniform(kb3, (1, OUTPUT_SIZE), jnp.float32, -0.05, 0.05)

    # W3^T padded 6->8 rows (padded rows are zero), b3 as a padded column vector.
    w3t = jnp.zeros((OP_PAD, HIDDEN), jnp.float32).at[:OUTPUT_SIZE, :].set(w3.T).astype(jnp.bfloat16)
    b3t = jnp.zeros((OP_PAD, 1), jnp.float32).at[:OUTPUT_SIZE, 0].set(b3[0])

    return {
        "n_context": n_context, "ctx_dim": ctx_dim, "d_in": d_in,
        # bf16 MXU weights (f32 accumulation in-kernel); W1 pre-split into feature segments.
        "w1x": w1[:POSE_DIM].astype(jnp.bfloat16),
        "w1ts": w1[POSE_DIM:POSE_DIM + HALF_T].astype(jnp.bfloat16),
        "w1tc": w1[POSE_DIM + HALF_T:POSE_DIM + TIME_DIM].astype(jnp.bfloat16),
        "w1c": w1[POSE_DIM + TIME_DIM:].astype(jnp.bfloat16),
        "b1": b1,
        "w2": w2.astype(jnp.bfloat16), "b2": b2,
        "w3t": w3t, "b3t": b3t,
        # unmodified f32 copies for the pure-JAX reference
        "_w1": w1, "_w2": w2, "_w3": w3, "_b3": b3,
    }


def se3_flow_matching_forward(params, x, t, context):
    """Forward pass of SE3FlowMatching: velocity field v(x, t | context) in R^6.

    x: (B, 4, 4) f32 SE(3) matrices; t: (B,) f32; context: (B, n_context, 4, 4) f32.
    Returns (B, 6) f32.
    """
    B = x.shape[0]
    tb, bp = _choose_batch_tiling(B)
    pad = bp - B
    # Row-only padding to the batch tile (no padded feature columns, no bf16 HBM copies).
    x_flat = jnp.pad(x.reshape(B, POSE_DIM).astype(jnp.float32), ((0, pad), (0, 0)))
    t2d = jnp.pad(t.reshape(B, 1).astype(jnp.float32), ((0, pad), (0, 0)))
    c_flat = jnp.pad(context.reshape(B, -1).astype(jnp.float32), ((0, pad), (0, 0)))
    out_t = _mlp_pallas(x_flat, t2d, c_flat, params, tb, bp)   # (OP_PAD, bp)
    return out_t[:OUTPUT_SIZE, :B].T                           # (B, 6)


def se3_flow_matching_forward_ref(params, x, t, context):
    """Pure-JAX f32 reference for correctness checking."""
    B = x.shape[0]
    feat = jnp.concatenate(
        [x.reshape(B, POSE_DIM), sinusoidal_time_embedding(t, TIME_DIM), context.reshape(B, -1)],
        axis=-1)
    h = feat @ params["_w1"] + params["b1"]
    h = h * jax.nn.sigmoid(h)
    h = h @ params["_w2"] + params["b2"]
    h = h * jax.nn.sigmoid(h)
    return h @ params["_w3"] + params["_b3"]


# ----------------------------- main ---------------------------------------------
if __name__ == "__main__":
    key = jax.random.PRNGKey(0)
    n_context = 2
    kp, kdata = jax.random.split(key, 2)
    params = init_params(kp, n_context)

    def make_batch(k, B):
        kr, kt, ktime, kctx = jax.random.split(k, 4)
        rot_block = jax.random.normal(kr, (B, 3, 3), jnp.float32)
        trans = jax.random.normal(kt, (B, 3), jnp.float32)
        x = jnp.tile(jnp.eye(4, dtype=jnp.float32)[None], (B, 1, 1))
        x = x.at[:, :3, :3].set(rot_block)
        x = x.at[:, :3, 3].set(trans)
        t = jax.random.uniform(ktime, (B,), jnp.float32)
        context = jax.random.normal(kctx, (B, n_context, 4, 4), jnp.float32)
        return x, t, context

    k_small, k_mid, k_big = jax.random.split(kdata, 3)

    # Small demo batch (single-tile, full-extent-block path).
    x, t, ctx = make_batch(k_small, 8)
    out = jax.block_until_ready(se3_flow_matching_forward(params, x, t, ctx))
    ref = jax.block_until_ready(se3_flow_matching_forward_ref(params, x, t, ctx))
    np.testing.assert_allclose(np.asarray(out), np.asarray(ref), rtol=2e-2, atol=2e-2)
    assert out.shape == (8, OUTPUT_SIZE) and out.dtype == jnp.float32

    # Non-tile-aligned batch exercising row padding + the 2-tile (grid=2) path.
    xm, tm, cm = make_batch(k_mid, 200)
    out_m = jax.block_until_ready(se3_flow_matching_forward(params, xm, tm, cm))
    ref_m = jax.block_until_ready(se3_flow_matching_forward_ref(params, xm, tm, cm))
    np.testing.assert_allclose(np.asarray(out_m), np.asarray(ref_m), rtol=2e-2, atol=2e-2)
    assert out_m.shape == (200, OUTPUT_SIZE)

    # Moderate batch: two 256-row parallel grid steps (both v7x TensorCores busy).
    xb, tb_, cb = make_batch(k_big, 512)
    out_b = jax.block_until_ready(se3_flow_matching_forward(params, xb, tb_, cb))
    ref_b = jax.block_until_ready(se3_flow_matching_forward_ref(params, xb, tb_, cb))
    np.testing.assert_allclose(np.asarray(out_b), np.asarray(ref_b), rtol=2e-2, atol=2e-2)
    assert out_b.shape == (512, OUTPUT_SIZE) and out_b.dtype == jnp.float32

    print("KERNEL_OK")
</pallas_src>

<mosaic_0001>
module attributes {stable_mosaic.version = 11 : i64} {
  func.func @_mlp_kernel(%arg0: i32, %arg1: memref<8x16xf32, #tpu.memory_space<vmem>>, %arg2: memref<8x1xf32, #tpu.memory_space<vmem>>, %arg3: memref<8x32xf32, #tpu.memory_space<vmem>>, %arg4: memref<16x128xbf16, #tpu.memory_space<vmem>>, %arg5: memref<8x128xbf16, #tpu.memory_space<vmem>>, %arg6: memref<8x128xbf16, #tpu.memory_space<vmem>>, %arg7: memref<32x128xbf16, #tpu.memory_space<vmem>>, %arg8: memref<1x128xf32, #tpu.memory_space<vmem>>, %arg9: memref<128x128xbf16, #tpu.memory_space<vmem>>, %arg10: memref<1x128xf32, #tpu.memory_space<vmem>>, %arg11: memref<8x128xbf16, #tpu.memory_space<vmem>>, %arg12: memref<8x1xf32, #tpu.memory_space<vmem>>, %arg13: memref<8x8xf32, #tpu.memory_space<vmem>>) attributes {dimension_semantics = [#tpu.dimension_semantics<parallel>], iteration_bounds = array<i64: 1>, scalar_prefetch = 0 : i64, scratch_operands = 0 : i64, tpu.core_type = #tpu.core_type<tc>, window_params = [{transform_indices = @transform_0, window_bounds = array<i64: 8, 16>}, {transform_indices = @transform_1, window_bounds = array<i64: 8, 1>}, {transform_indices = @transform_2, window_bounds = array<i64: 8, 32>}, {pipeline_mode = #tpu.pipeline_mode<synchronous>, transform_indices = @transform_3, window_bounds = array<i64: 16, 128>}, {pipeline_mode = #tpu.pipeline_mode<synchronous>, transform_indices = @transform_4, window_bounds = array<i64: 8, 128>}, {pipeline_mode = #tpu.pipeline_mode<synchronous>, transform_indices = @transform_5, window_bounds = array<i64: 8, 128>}, {pipeline_mode = #tpu.pipeline_mode<synchronous>, transform_indices = @transform_6, window_bounds = array<i64: 32, 128>}, {pipeline_mode = #tpu.pipeline_mode<synchronous>, transform_indices = @transform_7, window_bounds = array<i64: 1, 128>}, {pipeline_mode = #tpu.pipeline_mode<synchronous>, transform_indices = @transform_8, window_bounds = array<i64: 128, 128>}, {pipeline_mode = #tpu.pipeline_mode<synchronous>, transform_indices = @transform_9, window_bounds = array<i64: 1, 128>}, {pipeline_mode = #tpu.pipeline_mode<synchronous>, transform_indices = @transform_10, window_bounds = array<i64: 8, 128>}, {pipeline_mode = #tpu.pipeline_mode<synchronous>, transform_indices = @transform_11, window_bounds = array<i64: 8, 1>}, {transform_indices = @transform_12, window_bounds = array<i64: 8, 8>}]} {
    %0 = tpu.iota {dimensions = array<i32: 1>} : vector<1x8xi32>
    %1 = arith.sitofp %0 : vector<1x8xi32> to vector<1x8xf32>
    %cst = arith.constant -1.31576288 : f32
    %2 = vector.broadcast %cst : f32 to vector<1x8xf32>
    %3 = arith.mulf %1, %2 : vector<1x8xf32>
    %4 = math.exp %3 : vector<1x8xf32>
    %c0 = arith.constant 0 : index
    %c0_0 = arith.constant 0 : index
    %5 = vector.load %arg2[%c0, %c0_0] : memref<8x1xf32, #tpu.memory_space<vmem>>, vector<8x1xf32>
    %6 = vector.broadcast %5 : vector<8x1xf32> to vector<8x8xf32>
    %7 = vector.broadcast %4 : vector<1x8xf32> to vector<8x8xf32>
    %8 = arith.mulf %6, %7 : vector<8x8xf32>
    %9 = math.sin %8 : vector<8x8xf32>
    %10 = math.cos %8 : vector<8x8xf32>
    %c0_1 = arith.constant 0 : index
    %c0_2 = arith.constant 0 : index
    %11 = vector.load %arg1[%c0_1, %c0_2] : memref<8x16xf32, #tpu.memory_space<vmem>>, vector<8x16xf32>
    %12 = arith.truncf %11 : vector<8x16xf32> to vector<8x16xbf16>
    %c0_3 = arith.constant 0 : index
    %c0_4 = arith.constant 0 : index
    %13 = vector.load %arg4[%c0_3, %c0_4] : memref<16x128xbf16, #tpu.memory_space<vmem>>, vector<16x128xbf16>
    %cst_5 = arith.constant dense<0.000000e+00> : vector<8x128xf32>
    %14 = tpu.matmul %12, %13, %cst_5 {dimension_numbers = #tpu.dot_dimension_numbers<[1], [0], [0], [1], [0, 0, 1, 1], [], []>} : vector<8x16xbf16>, vector<16x128xbf16>, vector<8x128xf32> -> vector<8x128xf32>
    %15 = arith.truncf %9 : vector<8x8xf32> to vector<8x8xbf16>
    %c0_6 = arith.constant 0 : index
    %c0_7 = arith.constant 0 : index
    %16 = vector.load %arg5[%c0_6, %c0_7] : memref<8x128xbf16, #tpu.memory_space<vmem>>, vector<8x128xbf16>
    %cst_8 = arith.constant dense<0.000000e+00> : vector<8x128xf32>
    %17 = tpu.matmul %15, %16, %cst_8 {dimension_numbers = #tpu.dot_dimension_numbers<[1], [0], [0], [1], [0, 0, 1, 1], [], []>} : vector<8x8xbf16>, vector<8x128xbf16>, vector<8x128xf32> -> vector<8x128xf32>
    %18 = arith.addf %14, %17 : vector<8x128xf32>
    %19 = arith.truncf %10 : vector<8x8xf32> to vector<8x8xbf16>
    %c0_9 = arith.constant 0 : index
    %c0_10 = arith.constant 0 : index
    %20 = vector.load %arg6[%c0_9, %c0_10] : memref<8x128xbf16, #tpu.memory_space<vmem>>, vector<8x128xbf16>
    %cst_11 = arith.constant dense<0.000000e+00> : vector<8x128xf32>
    %21 = tpu.matmul %19, %20, %cst_11 {dimension_numbers = #tpu.dot_dimension_numbers<[1], [0], [0], [1], [0, 0, 1, 1], [], []>} : vector<8x8xbf16>, vector<8x128xbf16>, vector<8x128xf32> -> vector<8x128xf32>
    %22 = arith.addf %18, %21 : vector<8x128xf32>
    %c0_12 = arith.constant 0 : index
    %c0_13 = arith.constant 0 : index
    %23 = vector.load %arg3[%c0_12, %c0_13] : memref<8x32xf32, #tpu.memory_space<vmem>>, vector<8x32xf32>
    %24 = arith.truncf %23 : vector<8x32xf32> to vector<8x32xbf16>
    %c0_14 = arith.constant 0 : index
    %c0_15 = arith.constant 0 : index
    %25 = vector.load %arg7[%c0_14, %c0_15] : memref<32x128xbf16, #tpu.memory_space<vmem>>, vector<32x128xbf16>
    %cst_16 = arith.constant dense<0.000000e+00> : vector<8x128xf32>
    %26 = tpu.matmul %24, %25, %cst_16 {dimension_numbers = #tpu.dot_dimension_numbers<[1], [0], [0], [1], [0, 0, 1, 1], [], []>} : vector<8x32xbf16>, vector<32x128xbf16>, vector<8x128xf32> -> vector<8x128xf32>
    %27 = arith.addf %22, %26 : vector<8x128xf32>
    %c0_17 = arith.constant 0 : index
    %c0_18 = arith.constant 0 : index
    %28 = vector.load %arg8[%c0_17, %c0_18] : memref<1x128xf32, #tpu.memory_space<vmem>>, vector<1x128xf32>
    %29 = vector.broadcast %28 : vector<1x128xf32> to vector<8x128xf32>
    %30 = arith.addf %27, %29 : vector<8x128xf32>
    %cst_19 = arith.constant 0.000000e+00 : f32
    %31 = vector.broadcast %cst_19 : f32 to vector<8x128xf32>
    %32 = arith.subf %31, %30 : vector<8x128xf32>
    %33 = math.exp %32 : vector<8x128xf32>
    %cst_20 = arith.constant 1.000000e+00 : f32
    %34 = vector.broadcast %cst_20 : f32 to vector<8x128xf32>
    %35 = arith.addf %34, %33 : vector<8x128xf32>
    %36 = tpu.reciprocal %35 {approx = true} : vector<8x128xf32> -> vector<8x128xf32>
    %37 = arith.mulf %30, %36 : vector<8x128xf32>
    %38 = arith.truncf %37 : vector<8x128xf32> to vector<8x128xbf16>
    %c0_21 = arith.constant 0 : index
    %c0_22 = arith.constant 0 : index
    %39 = vector.load %arg9[%c0_21, %c0_22] : memref<128x128xbf16, #tpu.memory_space<vmem>>, vector<128x128xbf16>
    %cst_23 = arith.constant dense<0.000000e+00> : vector<8x128xf32>
    %40 = tpu.matmul %38, %39, %cst_23 {dimension_numbers = #tpu.dot_dimension_numbers<[1], [0], [0], [1], [0, 0, 1, 1], [], []>} : vector<8x128xbf16>, vector<128x128xbf16>, vector<8x128xf32> -> vector<8x128xf32>
    %c0_24 = arith.constant 0 : index
    %c0_25 = arith.constant 0 : index
    %41 = vector.load %arg10[%c0_24, %c0_25] : memref<1x128xf32, #tpu.memory_space<vmem>>, vector<1x128xf32>
    %42 = vector.broadcast %41 : vector<1x128xf32> to vector<8x128xf32>
    %43 = arith.addf %40, %42 : vector<8x128xf32>
    %cst_26 = arith.constant 0.000000e+00 : f32
    %44 = vector.broadcast %cst_26 : f32 to vector<8x128xf32>
    %45 = arith.subf %44, %43 : vector<8x128xf32>
    %46 = math.exp %45 : vector<8x128xf32>
    %cst_27 = arith.constant 1.000000e+00 : f32
    %47 = vector.broadcast %cst_27 : f32 to vector<8x128xf32>
    %48 = arith.addf %47, %46 : vector<8x128xf32>
    %49 = tpu.reciprocal %48 {approx = true} : vector<8x128xf32> -> vector<8x128xf32>
    %50 = arith.mulf %43, %49 : vector<8x128xf32>
    %c0_28 = arith.constant 0 : index
    %c0_29 = arith.constant 0 : index
    %51 = vector.load %arg11[%c0_28, %c0_29] : memref<8x128xbf16, #tpu.memory_space<vmem>>, vector<8x128xbf16>
    %52 = arith.truncf %50 : vector<8x128xf32> to vector<8x128xbf16>
    %cst_30 = arith.constant dense<0.000000e+00> : vector<8x8xf32>
    %53 = tpu.matmul %51, %52, %cst_30 {dimension_numbers = #tpu.dot_dimension_numbers<[1], [1], [0], [0], [0, 0, 1, 0], [], []>} : vector<8x128xbf16>, vector<8x128xbf16>, vector<8x8xf32> -> vector<8x8xf32>
    %c0_31 = arith.constant 0 : index
    %c0_32 = arith.constant 0 : index
    %54 = vector.load %arg12[%c0_31, %c0_32] : memref<8x1xf32, #tpu.memory_space<vmem>>, vector<8x1xf32>
    %55 = vector.broadcast %54 : vector<8x1xf32> to vector<8x8xf32>
    %56 = arith.addf %53, %55 : vector<8x8xf32>
    %c0_33 = arith.constant 0 : index
    %c0_34 = arith.constant 0 : index
    %57 = vector.load %arg13[%c0_33, %c0_34] : memref<8x8xf32, #tpu.memory_space<vmem>>, vector<8x8xf32>
    tpu.vector_store %arg13[%c0_33, %c0_34], %56 {strides = array<i32>} : memref<8x8xf32, #tpu.memory_space<vmem>>, vector<8x8xf32>,
    return
  }
  func.func @transform_0(%arg0: i32) -> (i32, i32) {
    %c0_i32 = arith.constant 0 : i32
    %c0_i32_0 = arith.constant 0 : i32
    return %arg0, %c0_i32 : i32, i32
  }
  func.func @transform_1(%arg0: i32) -> (i32, i32) {
    %c0_i32 = arith.constant 0 : i32
    %c0_i32_0 = arith.constant 0 : i32
    return %arg0, %c0_i32 : i32, i32
  }
  func.func @transform_2(%arg0: i32) -> (i32, i32) {
    %c0_i32 = arith.constant 0 : i32
    %c0_i32_0 = arith.constant 0 : i32
    return %arg0, %c0_i32 : i32, i32
  }
  func.func @transform_3(%arg0: i32) -> (i32, i32) {
    %c0_i32 = arith.constant 0 : i32
    %c0_i32_0 = arith.constant 0 : i32
    %c0_i32_1 = arith.constant 0 : i32
    return %c0_i32, %c0_i32_0 : i32, i32
  }
  func.func @transform_4(%arg0: i32) -> (i32, i32) {
    %c0_i32 = arith.constant 0 : i32
    %c0_i32_0 = arith.constant 0 : i32
    %c0_i32_1 = arith.constant 0 : i32
    return %c0_i32, %c0_i32_0 : i32, i32
  }
  func.func @transform_5(%arg0: i32) -> (i32, i32) {
    %c0_i32 = arith.constant 0 : i32
    %c0_i32_0 = arith.constant 0 : i32
    %c0_i32_1 = arith.constant 0 : i32
    return %c0_i32, %c0_i32_0 : i32, i32
  }
  func.func @transform_6(%arg0: i32) -> (i32, i32) {
    %c0_i32 = arith.constant 0 : i32
    %c0_i32_0 = arith.constant 0 : i32
    %c0_i32_1 = arith.constant 0 : i32
    return %c0_i32, %c0_i32_0 : i32, i32
  }
  func.func @transform_7(%arg0: i32) -> (i32, i32) {
    %c0_i32 = arith.constant 0 : i32
    %c0_i32_0 = arith.constant 0 : i32
    %c0_i32_1 = arith.constant 0 : i32
    return %c0_i32, %c0_i32_0 : i32, i32
  }
  func.func @transform_8(%arg0: i32) -> (i32, i32) {
    %c0_i32 = arith.constant 0 : i32
    %c0_i32_0 = arith.constant 0 : i32
    %c0_i32_1 = arith.constant 0 : i32
    return %c0_i32, %c0_i32_0 : i32, i32
  }
  func.func @transform_9(%arg0: i32) -> (i32, i32) {
    %c0_i32 = arith.constant 0 : i32
    %c0_i32_0 = arith.constant 0 : i32
    %c0_i32_1 = arith.constant 0 : i32
    return %c0_i32, %c0_i32_0 : i32, i32
  }
  func.func @transform_10(%arg0: i32) -> (i32, i32) {
    %c0_i32 = arith.constant 0 : i32
    %c0_i32_0 = arith.constant 0 : i32
    %c0_i32_1 = arith.constant 0 : i32
    return %c0_i32, %c0_i32_0 : i32, i32
  }
  func.func @transform_11(%arg0: i32) -> (i32, i32) {
    %c0_i32 = arith.constant 0 : i32
    %c0_i32_0 = arith.constant 0 : i32
    %c0_i32_1 = arith.constant 0 : i32
    return %c0_i32, %c0_i32_0 : i32, i32
  }
  func.func @transform_12(%arg0: i32) -> (i32, i32) {
    %c0_i32 = arith.constant 0 : i32
    %c0_i32_0 = arith.constant 0 : i32
    return %c0_i32, %arg0 : i32, i32
  }
}

</mosaic_0001>

<bundles_post_ra>
// kernel: tpu_custom_call.1
= control target key start
LH: loop header
LB: loop body
LE: loop exit
PB: predicated region body
PF: predicated region fallthrough
CT: control target
= control target key end

     0   :  { %17 = vsyncpa [#allocation3], 0  ;;  %s1166_s0 = inlined_call_operand.vmem [shape: f32[8,16], index: 0, kind: input, shape index: {}]   ;;  %s1167_s1 = inlined_call_operand.vmem [shape: f32[8,1], index: 1, kind: input, shape index: {}]   ;;  %s1168_s2 = inlined_call_operand.vmem [shape: f32[8,32], index: 2, kind: input, shape index: {}]   ;;  %s1169_s3 = inlined_call_operand.hbm [shape: bf16[16,128], index: 3, kind: input, shape index: {}]   ;;  %s1170_s4 = inlined_call_operand.hbm [shape: bf16[8,128], index: 4, kind: input, shape index: {}]   ;;  %s1171_s5 = inlined_call_operand.vmem [shape: bf16[8,128], index: 5, kind: input, shape index: {}]   ;;  %s1172_s6 = inlined_call_operand.vmem [shape: bf16[32,128], index: 6, kind: input, shape index: {}]   ;;  %s1173_s7 = inlined_call_operand.vmem [shape: f32[1,128], index: 7, kind: input, shape index: {}]   ;;  %s1174_s8 = inlined_call_operand.hbm [shape: bf16[128,128], index: 8, kind: input, shape index: {}]   ;;  %s1175_s9 = inlined_call_operand.vmem [shape: f32[1,128], index: 9, kind: input, shape index: {}]   ;;  %s1176_s10 = inlined_call_operand.vmem [shape: bf16[8,128], index: 10, kind: input, shape index: {}]   ;;  %s1177_s11 = inlined_call_operand.vmem [shape: f32[8,1], index: 11, kind: input, shape index: {}]   ;;  %s1178_s12 = inlined_call_operand.hbm [shape: f32[8,8], index: 12, kind: output, shape index: {}]  }
   0x1   :  { %18 = vsyncpa [#allocation6], 0 }
   0x2   :  { %19 = vsyncpa [#allocation4], 0  ;;  %s951_s21 = smov [#allocation5]   ;;  %s952_s23 = smov [#allocation2]  }
   0x3   :  { %s44_s22 = sshll.u32 %s951_s21, 4  ;;  %s31_s24 = sshll.u32 %s952_s23, 4  ;;  %s45_s22 = int_to_ptr.vmem [resolvable:$true] %s44_s22  ;;  %s1031_s24 = int_to_ptr.vmem [resolvable:$true] %s31_s24 }
   0x4   :  { %s857_s27 = scalar_lea.hbm %s1170_s4, 64 }
   0x5   :  { %p858_p0 = scmp.ne.s32.totalorder %s1170_s4, %s857_s27  ;;  %p861_p1 = scmp.lt.u32.totalorder %s857_s27, %s1170_s4 }
   0x7   :  { %p863_p2 = pnand %p861_p1, %p858_p0 }
   0x9   :  { %866 = shalt.err (!%p863_p2)
}
   0xa   :  { %s867_s14 = scalar_lea.vmem %s45_s22, 64  ;;  %p872_p4 = scmp.lt.s32.totalorder %s45_s22, %s45_s22 }
   0xb   :  { %p868_p3 = scmp.ne.s32.totalorder %s45_s22, %s867_s14  ;;  %p873_p5 = scmp.lt.s32.totalorder %s867_s14, %s867_s14 }
   0xd   :  { %p874_p6 = por %p873_p5, %p872_p4 }
   0xf   :  { %p875_p7 = pnand %p874_p6, %p868_p3 }
  0x11   :  { %878 = shalt.err (!%p875_p7)
}
  0x12   :  { %47 = dma.hbm_to_vmem [thread:$0]  %s1170_s4, 64, %s45_s22, [#allocation6]  }
  0x13   :  { %s879_s19 = scalar_lea.hbm %s1169_s3, 128 }
  0x14   :  { %p880_p8 = scmp.ne.s32.totalorder %s1169_s3, %s879_s19  ;;  %p883_p9 = scmp.lt.u32.totalorder %s879_s19, %s1169_s3 }
  0x16   :  { %p885_p10 = pnand %p883_p9, %p880_p8 }
  0x18   :  { %888 = shalt.err (!%p885_p10)
}
  0x19   :  { %s889_s26 = scalar_lea.vmem %s1031_s24, 128  ;;  %p894_p12 = scmp.lt.s32.totalorder %s1031_s24, %s1031_s24 }
  0x1a   :  { %p890_p11 = scmp.ne.s32.totalorder %s1031_s24, %s889_s26  ;;  %p895_p13 = scmp.lt.s32.totalorder %s889_s26, %s889_s26 }
  0x1c   :  { %p896_p0 = por %p895_p13, %p894_p12 }
  0x1e   :  { %p897_p1 = pnand %p896_p0, %p890_p11 }
  0x20   :  { %900 = shalt.err (!%p897_p1)
}
  0x21   :  { %s953_s4 = smov 64   ;;  %s954_s22 = smov 4  }
  0x22   :  { %37 = dma.hbm_to_vmem [thread:$0]  %s1169_s3, 128, %s1031_s24, [#allocation3], %s953_s4, %s953_s4, %s954_s22  }
  0x23   :  { %s955_s29 = smov [#allocation7]   ;;  %s901_s15 = scalar_lea.hbm %s1174_s8, 1024 }
  0x24   :  { %s59_s30 = sshll.u32 %s955_s29, 4  ;;  %p902_p2 = scmp.ne.s32.totalorder %s1174_s8, %s901_s15  ;;  %s60_s30 = int_to_ptr.vmem [resolvable:$true] %s59_s30 }
  0x25   :  { %p905_p3 = scmp.lt.u32.totalorder %s901_s15, %s1174_s8 }
  0x27   :  { %p907_p4 = pnand %p905_p3, %p902_p2 }
  0x29   :  { %910 = shalt.err (!%p907_p4)
}
  0x2a   :  { %s911_s20 = scalar_lea.vmem %s60_s30, 1024  ;;  %p916_p6 = scmp.lt.s32.totalorder %s60_s30, %s60_s30 }
  0x2b   :  { %p912_p5 = scmp.ne.s32.totalorder %s60_s30, %s911_s20  ;;  %p917_p7 = scmp.lt.s32.totalorder %s911_s20, %s911_s20 }
  0x2d   :  { %p918_p8 = por %p917_p7, %p916_p6 }
  0x2f   :  { %p919_p9 = pnand %p918_p8, %p912_p5 }
  0x31   :  { %922 = shalt.err (!%p919_p9)
}
  0x32   :  { %65 = dma.hbm_to_vmem [thread:$0]  %s1174_s8, 1024, %s60_s30, [#allocation6], %s953_s4, %s953_s4, %s954_s22  }
  0x33   :  { %945 = dma.done.wait [#allocation3], 128  }
  0x34   :  { %946 = vsyncadd [#allocation3], 4294967168 }
  0x35   :  { %947 = dma.done.wait [#allocation6], 1088  }
  0x36   :  { %948 = vsyncadd [#allocation6], 4294966208  ;;  %v956_v0 = vmov 0   ;;  %v88_v1 = vld [vmem:[%s1167_s1] sm:$0xff]  ;;  %v307_v3 = vld [vmem:[#allocation5] sm:$0xf]  ;;  %v82_v8 = vlaneseq }
  0x37   :  { %831 = vset.pattern.permute.xlu0 %v956_v0  ;;  %v652_v2 = vld [vmem:[%s1177_s11] sm:$0xff]  ;;  %vm312_vm0 = vcmask 1043456   ;;  %v957_v5 = vmov 0.0   ;;  %vm958_vm1 = vmmov 0   ;;  %v959_v26 = vmov 683565275  }
  0x38   :  { %91 = vperm.xlu0 %831, %v88_v1   ;;  %v407_v4 = vld [vmem:[%s1171_s5] sm:$0xf]  ;;  %760 = vmatprep.subr.bf16.mxu1 %v957_v5  ;;  %v314_v6 = vsel %vm312_vm0, %v307_v3, 0  ;;  %v83_v9 = vand.u32 127, %v82_v8  ;;  %v960_v28 = vmov 2475754826  }
  0x39   :  { %772 = vmatprep.subr.bf16.mxu0 %v957_v5  ;;  %v412_v7 = vsel %vm312_vm0, %v407_v4, 0  ;;  %761 = vmatpush3.bf16.msra.mxu1 %v314_v6  ;;  %v961_v31 = vmov 2131351028   ;;  %v962_v34 = vmov 2102212464  }
  0x3a   :  { %773 = vmatpush3.bf16.msra.mxu0 %v412_v7  ;;  %762 = vmatprep.mubr.msk.bf16.mxu1 %vm958_vm1, %v957_v5  ;;  %v84_v10 = vcvt.s32.f32 %v83_v9  ;;  %v963_v37 = vmov 920167782   ;;  %v964_v40 = vmov 1326507024  }
  0x3b   :  { %774 = vmatprep.mubr.msk.bf16.mxu0 %vm958_vm1, %v957_v5  ;;  %766 = vmatprep.subr.bf16.mxu1 %v957_v5 }
  0x3c   :  { %655 = vperm.xlu0 %831, %v652_v2   ;;  %786 = vmatprep.subr.bf16.mxu0 %v957_v5  ;;  %v85_v11 = vmul.f32 -1.3157629, %v84_v10 }
  0x3e   :  { %v86_v12 = vmul.f32 1.442695, %v85_v11 }
  0x40   :  { %843 = vpow2.f32 %v86_v12 }
  0x4a   :  { %v844_v13 = vpop.eup %843 }
  0xb7   :  { %v92_v14 = vpop.permute.xlu0 %91 }
  0xb8   :  { %v1091_v15 = vmul.f32 %v844_v13, %v92_v14 }
  0xba   :  { %v98_v16 = vand.u32 2139095040, %v1091_v15  ;;  %v95_v20 = vand.u32 2147483647, %v1091_v15  ;;  %vm97_vm9 = vcmp.lt.s32.totalorder %v1091_v15, 0 }
  0xbc   :  { %v99_v17 = vshrl.u32 %v98_v16, 23  ;;  %v102_v23 = vand.u32 8388607, %v95_v20  ;;  %vm96_vm10 = vcmp.le.f32.partialorder %v95_v20, 0.7853982 }
  0xbe   :  { %v715_v18 = vadd.s32 4294967169, %v99_v17  ;;  %v103_v42 = vor.u32 8388608, %v102_v23 }
  0xc0   :  { %v105_v19 = vadd.s32 1, %v715_v18  ;;  %v143_v56 = vshll.u32 %v103_v42, 8 }
  0xc2   :  { %vm106_vm2 = vcmp.gt.s32.totalorder %v105_v19, 0 }
  0xc3   :  { %v107_v21 = vsel %vm106_vm2, %v105_v19, 0  ;;  %vm187_vm2 = vweird.f32 %v1091_v15 }
  0xc4   :  { %v109_v22 = vand.u32 31, %v107_v21  ;;  %v108_v25 = vshrl.u32 %v107_v21, 5 }
  0xc6   :  { %v110_v24 = vsub.s32 32, %v109_v22  ;;  %v112_v27 = vshll.u32 %v959_v26, %v109_v22  ;;  %v115_v29 = vshll.u32 %v960_v28, %v109_v22  ;;  %v118_v33 = vshll.u32 %v961_v31, %v109_v22 }
  0xc7   :  { %v121_v36 = vshll.u32 %v962_v34, %v109_v22  ;;  %v124_v39 = vshll.u32 %v963_v37, %v109_v22  ;;  %vm127_vm3 = vcmp.lt.s32.totalorder %v108_v25, 1  ;;  %vm130_vm4 = vcmp.lt.s32.totalorder %v108_v25, 4 }
  0xc8   :  { %v113_v30 = vshrl.u32 %v960_v28, %v110_v24  ;;  %v116_v32 = vshrl.u32 %v961_v31, %v110_v24  ;;  %v119_v35 = vshrl.u32 %v962_v34, %v110_v24  ;;  %v122_v38 = vshrl.u32 %v963_v37, %v110_v24 }
  0xc9   :  { %v125_v41 = vshrl.u32 %v964_v40, %v110_v24  ;;  %v111_v51 = vshrl.u32 %v959_v26, %v110_v24  ;;  %vm129_vm5 = vcmp.lt.s32.totalorder %v108_v25, 3  ;;  %vm128_vm6 = vcmp.lt.s32.totalorder %v108_v25, 2 }
  0xca   :  { %v114_v43 = vor.u32 %v113_v30, %v112_v27  ;;  %v117_v44 = vor.u32 %v116_v32, %v115_v29  ;;  %v120_v45 = vor.u32 %v119_v35, %v118_v33  ;;  %v123_v46 = vor.u32 %v122_v38, %v121_v36 }
  0xcb   :  { %v126_v47 = vor.u32 %v125_v41, %v124_v39 }
  0xcc   :  { %v132_v48 = vsel %vm130_vm4, %v120_v45, 2102212464  ;;  %v135_v49 = vsel %vm127_vm3, %v114_v43, %v117_v44  ;;  %v139_v50 = vsel %vm127_vm3, %v117_v44, %v120_v45  ;;  %v136_v52 = vsel %vm130_vm4, %v123_v46, 920167782 }
  0xcd   :  { %v140_v53 = vsel %vm130_vm4, %v126_v47, 1326507024  ;;  %v137_v54 = vsel %vm129_vm5, %v120_v45, %v136_v52  ;;  %v131_v57 = vsel %vm127_vm3, %v111_v51, %v114_v43  ;;  %v133_v58 = vsel %vm129_vm5, %v117_v44, %v132_v48 }
  0xce   :  { %v141_v55 = vsel %vm129_vm5, %v123_v46, %v140_v53  ;;  %v138_v59 = vsel %vm128_vm6, %v135_v49, %v137_v54  ;;  %v134_v1 = vsel %vm128_vm6, %v131_v57, %v133_v58  ;;  %vm308_vm3 = vcmask 64512   ;;  %v833_v54 = vld [vmem:[%s1172_s6] sm:$0xff]   ;;  %v835_v58 = vld [vmem:[#allocation7] sm:$0xff]  }
  0xcf   :  { %v142_v60 = vsel %vm128_vm6, %v139_v50, %v141_v55  ;;  %v1100_v63 = vmul.u32.u64.low %v143_v56, %v138_v59  ;;  %v1101_v0 = vmul.u32.u64.high %v143_v56, %v138_v59, %v1100_v63  ;;  %v150_v3 = vmul.u32 %v143_v56, %v134_v1  ;;  %v832_v50 = vld [vmem:[#allocation2] sm:$0xff]   ;;  %v834_v55 = vld [vmem:[%s1172_s6 + $0x8] sm:$0xff]   ;;  %v836_v59 = vld [vmem:[#allocation7 + $0x8] sm:$0xff]  }
  0xd0   :  { %v1097_v61 = vmul.u32.u64.low %v143_v56, %v142_v60  ;;  %v1098_v62 = vmul.u32.u64.high %v143_v56, %v142_v60, %v1097_v61  ;;  %vm362_vm4 = vcmask 130048   ;;  %v455_v56 = vld [vmem:[%s1168_s2] sm:$0xff]  ;;  %vm473_vm5 = vcmask 261120  }
  0xd1   :  { %v153_v2 = vadd.s32 1, %v1101_v0  ;;  %v456_v57 = vpack.c.bf16 %v455_v56, %v455_v56  ;;  %v837_v60 = vld [vmem:[#allocation7 + $0x10] sm:$0xff]   ;;  %v838_v61 = vld [vmem:[#allocation7 + $0x18] sm:$0xff]  }
  0xd2   :  { %vm152_vm7 = vc.u32 %v1098_v62, %v1100_v63  ;;  %v151_v17 = vadd.s32 %v1100_v63, %v1098_v62  ;;  %v839_v62 = vld [vmem:[#allocation7 + $0x20] sm:$0xff]   ;;  %v840_v63 = vld [vmem:[#allocation7 + $0x28] sm:$0xff]   ;;  %v842_v1 = vld [vmem:[#allocation7 + $0x38] sm:$0xff]  }
  0xd3   :  { %v154_v4 = vsel %vm152_vm7, %v153_v2, %v1101_v0  ;;  %v841_v0 = vld [vmem:[#allocation7 + $0x30] sm:$0xff]  }
  0xd4   :  { %v155_v6 = vadd.s32 %v154_v4, %v150_v3 }
  0xd6   :  { %v156_v7 = vadd.s32 536870912, %v155_v6 }
  0xd8   :  { %v157_v8 = vshrl.u32 %v156_v7, 30 }
  0xda   :  { %v158_v9 = vshll.u32 %v157_v8, 30  ;;  %v181_v30 = vsub.s32 4, %v157_v8 }
  0xdc   :  { %v159_v10 = vsub.s32 %v155_v6, %v158_v9  ;;  %v182_v33 = vsel %vm97_vm9, %v181_v30, %v157_v8 }
  0xdd   :  { %v184_v35 = vsel %vm96_vm10, 0, %v182_v33 }
  0xde   :  { %v161_v11 = vsub.s32 0, %v159_v10  ;;  %v188_v36 = vadd.s32 3, %v184_v35  ;;  %v292_v38 = vand.u32 3, %v184_v35 }
  0xe0   :  { %v716_v12 = vmin.u32 %v161_v11, %v159_v10  ;;  %v189_v37 = vand.u32 3, %v188_v36  ;;  %vm297_vm12 = vcmp.eq.s32.totalorder %v292_v38, 2  ;;  %vm294_vm14 = vcmp.eq.s32.totalorder %v292_v38, 0 }
  0xe1   :  { %vm293_vm0 = vcmp.lt.s32.totalorder %v292_v38, 2 }
  0xe2   :  { %v163_v13 = vclz %v716_v12  ;;  %vm194_vm11 = vcmp.eq.s32.totalorder %v189_v37, 2  ;;  %vm191_vm13 = vcmp.eq.s32.totalorder %v189_v37, 0  ;;  %vm190_vm15 = vcmp.lt.s32.totalorder %v189_v37, 2 }
  0xe4   :  { %v717_v14 = vadd.s32 4294967294, %v163_v13 }
  0xe6   :  { %vm718_vm8 = vcmp.lt.s32.totalorder %v717_v14, 0 }
  0xe7   :  { %v166_v16 = vsel %vm718_vm8, 0, %v717_v14 }
  0xe8   :  { %v167_v18 = vsub.s32 32, %v166_v16  ;;  %v171_v19 = vsub.s32 4294967266, %v166_v16  ;;  %v168_v21 = vshll.u32 %v159_v10, %v166_v16 }
  0xea   :  { %v169_v22 = vshrl.u32 %v151_v17, %v167_v18  ;;  %v172_v23 = vadd.s32 127, %v171_v19 }
  0xec   :  { %v170_v24 = vor.u32 %v169_v22, %v168_v21  ;;  %v173_v25 = vshll.u32 %v172_v23, 23 }
  0xee   :  { %v174_v26 = vor.u32 4788187, %v173_v25  ;;  %v177_v28 = vcvt.s32.f32 %v170_v24 }
  0xf0   :  { %v175_v27 = vand.u32 2147483647, %v174_v26 }
  0xf2   :  { %v178_v29 = vmul.f32 %v177_v28, %v175_v27 }
  0xf4   :  { %v179_v31 = vxor.u32 2147483648, %v178_v29 }
  0xf6   :  { %v180_v32 = vsel %vm97_vm9, %v179_v31, %v178_v29 }
  0xf7   :  { %v183_v34 = vsel %vm96_vm10, %v1091_v15, %v180_v32  ;;  %v302_v15 = vld [vmem:[%s1166_s0] sm:$0xff] }
  0xf8   :  { %845 = vcosq.f32 %v183_v34  ;;  %v303_v53 = vpack.c.bf16 %v302_v15, %v302_v15  ;;  %v731_v32 = vld [vmem:[%s1175_s9] ss:$0 sm:$0xff]  ;;  %s965_s9 = smov [#allocation8]  }
  0xf9   :  { %847 = vsinq.f32 %v183_v34  ;;  %s705_s15 = sshll.u32 %s965_s9, 4  ;;  %s706_s15 = int_to_ptr.vmem [resolvable:$true] %s705_s15 }
  0xfa   :  { %s923_s16 = scalar_lea.vmem %s706_s15, 128  ;;  %p928_p11 = scmp.lt.s32.totalorder %s706_s15, %s706_s15 }
  0xfb   :  { %p924_p10 = scmp.ne.s32.totalorder %s706_s15, %s923_s16  ;;  %p929_p12 = scmp.lt.s32.totalorder %s923_s16, %s923_s16 }
  0xfd   :  { %p930_p13 = por %p929_p12, %p928_p11 }
  0xff   :  { %p931_p0 = pnand %p930_p13, %p924_p10 }
 0x102   :  { %v846_v39 = vpop.eup %845 }
 0x103   :  { %v848_v40 = vpop.eup %847  ;;  %v195_v41 = vxor.u32 2147483648, %v846_v39 }
 0x104   :  { %v192_v42 = vxor.u32 2147483648, %v848_v40 }
 0x105   :  { %v196_v43 = vsel %vm194_vm11, %v195_v41, %v848_v40  ;;  %v299_v20 = vsel %vm297_vm12, %v195_v41, %v848_v40 }
 0x106   :  { %v193_v44 = vsel %vm191_vm13, %v846_v39, %v192_v42  ;;  %v296_v45 = vsel %vm294_vm14, %v846_v39, %v192_v42 }
 0x107   :  { %v197_v46 = vsel %vm190_vm15, %v193_v44, %v196_v43  ;;  %v300_v47 = vsel %vm293_vm0, %v296_v45, %v299_v20  ;;  %v650_v44 = vld [vmem:[%s1176_s10] sm:$0xf]  ;;  %v656_v45 = vpop.permute.xlu0 %655 }
 0x108   :  { %v198_v48 = vsel %vm187_vm2, nan, %v197_v46  ;;  %v301_v49 = vsel %vm187_vm2, nan, %v300_v47 }
 0x109   :  { %v306_v51 = vpack.c.bf16 %v198_v48, %v198_v48  ;;  %v406_v52 = vpack.c.bf16 %v301_v49, %v301_v49 }
 0x10b   :  { %763 = vmatmul.mubr.msk.bf16.vlgmr.msra.gmra.mrb[0].mxu1 %vm308_vm3, %v306_v51  ;;  %775 = vmatmul.mubr.msk.bf16.vlgmr.msra.gmra.mrb[0].mxu0 %vm308_vm3, %v406_v52 }
 0x10c   :  { %767 = vmatpush3.bf16.msra.mxu1 %v832_v50  ;;  %768 = vmatprep.mubr.msk.bf16.mxu1 %vm958_vm1, %v957_v5 }
 0x10d   :  { %778 = vmatprep.subr.bf16.mxu1 %v957_v5  ;;  %802 = vmatprep.mubr.msk.bf16.mxu0 %vm958_vm1, %v957_v5 }
 0x10e   :  { %787 = vmatpush3.bf16.msra.mxu0 %v835_v58 }
 0x10f   :  { %788 = vmatprep.subr.bf16.mxu0 %v957_v5 }
 0x112   :  { %789 = vmatpush3.bf16.msra.mxu0 %v836_v59 }
 0x113   :  { %769 = vmatmul.mubr.msk.bf16.vlgmr.msra.gmra.mrb[4].mxu1 %vm362_vm4, %v303_v53  ;;  %790 = vmatprep.subr.bf16.mxu0 %v957_v5 }
 0x114   :  { %779 = vmatpush3.bf16.msra.mxu1 %v833_v54  ;;  %782 = vmatprep.mubr.msk.bf16.mxu1 %vm958_vm1, %v957_v5 }
 0x115   :  { %780 = vmatprep.subr.bf16.mxu1 %v957_v5 }
 0x116   :  { %791 = vmatpush3.bf16.msra.mxu0 %v837_v60 }
 0x117   :  { %792 = vmatprep.subr.bf16.mxu0 %v957_v5 }
 0x118   :  { %781 = vmatpush3.bf16.msra.mxu1 %v834_v55 }
 0x119   :  { %806 = vmatprep.subr.bf16.mxu1 %v957_v5 }
 0x11a   :  { %793 = vmatpush3.bf16.msra.mxu0 %v838_v61 }
 0x11b   :  { %783 = vmatmul.mubr.msk.bf16.vlgmr.msra.gmra.mrb[8].mxu1 %vm473_vm5, %v456_v57  ;;  %794 = vmatprep.subr.bf16.mxu0 %v957_v5 }
 0x11c   :  { %808 = vmatprep.mubr.msk.bf16.mxu1 %vm958_vm1, %v957_v5 }
 0x11e   :  { %795 = vmatpush3.bf16.msra.mxu0 %v839_v62 }
 0x11f   :  { %796 = vmatprep.subr.bf16.mxu0 %v957_v5 }
 0x122   :  { %797 = vmatpush3.bf16.msra.mxu0 %v840_v63 }
 0x123   :  { %798 = vmatprep.subr.bf16.mxu0 %v957_v5 }
 0x126   :  { %799 = vmatpush3.bf16.msra.mxu0 %v841_v0 }
 0x127   :  { %800 = vmatprep.subr.bf16.mxu0 %v957_v5  ;;  %v730_v5 = vld [vmem:[%s1173_s7] ss:$0 sm:$0xff] }
 0x12a   :  { %801 = vmatpush3.bf16.msra.mxu0 %v842_v1 }
 0x1de   :  { %v350_v2 = vpop.f32.mrb[0].mxu1  ;;  %v448_v3 = vpop.f32.mrb[0].mxu0 }
 0x1df   :  { %v764_v4 = vpop.f32.mrb[1].mxu1  ;;  %v776_v6 = vpop.f32.mrb[1].mxu0 }
 0x1e0   :  { %v353_v7 = vpop.f32.mrb[2].mxu1  ;;  %v451_v8 = vpop.f32.mrb[2].mxu0 }
 0x1e1   :  { %v765_v9 = vpop.f32.mrb[3].mxu1  ;;  %v777_v10 = vpop.f32.mrb[3].mxu0 }
 0x1e6   :  { %v400_v11 = vpop.f32.mrb[4].mxu1 }
 0x1e7   :  { %v401_v12 = vadd.f32 %v400_v11, %v350_v2  ;;  %v770_v13 = vpop.f32.mrb[5].mxu1 }
 0x1e8   :  { %v403_v14 = vpop.f32.mrb[6].mxu1 }
 0x1e9   :  { %v771_v16 = vpop.f32.mrb[7].mxu1  ;;  %v454_v17 = vadd.f32 %v448_v3, %v401_v12 }
 0x1ee   :  { %v511_v18 = vpop.f32.mrb[8].mxu1 }
 0x1ef   :  { %v517_v19 = vadd.f32 %v511_v18, %v454_v17  ;;  %v784_v21 = vpop.f32.mrb[9].mxu1 }
 0x1f0   :  { %v514_v22 = vpop.f32.mrb[10].mxu1 }
 0x1f1   :  { %v525_v23 = vadd.f32 %v730_v5, %v517_v19  ;;  %v785_v24 = vpop.f32.mrb[11].mxu1 }
 0x1f3   :  { %v526_v25 = vsub.f32 0.0, %v525_v23 }
 0x1f5   :  { %v527_v26 = vmul.f32 1.442695, %v526_v25 }
 0x1f7   :  { %849 = vpow2.f32 %v527_v26 }
 0x201   :  { %v850_v27 = vpop.eup %849 }
 0x202   :  { %v529_v28 = vadd.f32 1.0, %v850_v27 }
 0x204   :  { %851 = vrcp.f32 %v529_v28 }
 0x20e   :  { %v852_v29 = vpop.eup %851 }
 0x20f   :  { %v531_v30 = vmul.f32 %v852_v29, %v525_v23 }
 0x211   :  { %v532_v31 = vpack.c.bf16 %v531_v30, %v531_v30 }
 0x213   :  { %803 = vmatmul.mubr.bf16.vlgmr.msra.gmra.mrb[4].mxu0 %v532_v31 }
 0x2e6   :  { %v638_v33 = vpop.f32.mrb[4].mxu0 }
 0x2e7   :  { %v639_v34 = vadd.f32 %v731_v32, %v638_v33  ;;  %v804_v35 = vpop.f32.mrb[5].mxu0 }
 0x2e8   :  { %v641_v36 = vpop.f32.mrb[6].mxu0 }
 0x2e9   :  { %v644_v37 = vsub.f32 0.0, %v639_v34  ;;  %v805_v38 = vpop.f32.mrb[7].mxu0 }
 0x2eb   :  { %v645_v39 = vmul.f32 1.442695, %v644_v37 }
 0x2ed   :  { %853 = vpow2.f32 %v645_v39 }
 0x2f7   :  { %v854_v40 = vpop.eup %853 }
 0x2f8   :  { %v647_v41 = vadd.f32 1.0, %v854_v40 }
 0x2fa   :  { %855 = vrcp.f32 %v647_v41 }
 0x304   :  { %v856_v42 = vpop.eup %855 }
 0x305   :  { %v649_v43 = vmul.f32 %v856_v42, %v639_v34 }
 0x307   :  { %v651_v20 = vpack.c.bf16 %v649_v43, %v649_v43 }
 0x309   :  { %807 = vmatpush3.bf16.xpose.msra.mxu1 %v651_v20 }
 0x310   :  { %809 = vmatmul.mubr.bf16.vlgmr.msra.gmra.mrb[12].mxu1 %v650_v44 }
 0x3e3   :  { %v692_v46 = vpop.f32.mrb[12].mxu1 }
 0x3e4   :  { %v693_v47 = vadd.f32 %v692_v46, %v656_v45  ;;  %v810_v48 = vpop.f32.mrb[13].mxu1 }
 0x3e5   :  { %v695_v49 = vpop.f32.mrb[14].mxu1 }
 0x3e6   :  { %698 = vst.msk [vmem:[#allocation8] sm:$0xff] %vm308_vm3, %v693_v47  ;;  %v811_v50 = vpop.f32.mrb[15].mxu1 }
 0x3e7   :  { %934 = shalt.err (!%p931_p0)
}
 0x3e8   :  { %s935_s18 = scalar_lea.hbm %s1178_s12, 128 }
 0x3e9   :  { %p936_p1 = scmp.ne.s32.totalorder %s1178_s12, %s935_s18  ;;  %p939_p2 = scmp.lt.u32.totalorder %s935_s18, %s1178_s12 }
 0x3eb   :  { %p941_p3 = pnand %p939_p2, %p936_p1 }
 0x3ed   :  { %944 = shalt.err (!%p941_p3)
}
 0x3ee   :  { %708 = dma.vmem_to_hbm [thread:$0]  %s706_s15, 128, %s1178_s12, [#allocation4]  }
 0x3ef   :  { %949 = dma.done.wait [#allocation4], 128  }
 0x3f0   :  { %950 = vsyncadd [#allocation4], 4294967168 }
 0x3f1   :  { %712 = vsyncpa [#allocation3], 1 }
 0x3f2   :  { %713 = vsyncpa [#allocation6], 1 }
 0x3f3   :  { %714 = vsyncpa [#allocation4], 1 }

</bundles_post_ra>
